<compile_context>
chip_gen: v5e
topology: v5e:2x2
jax: 0.10.0
libtpu: 0.0.40
codegen_flags: <defaults>
</compile_context>

<pallas_src>
import jax
import jax.numpy as jnp
from jax.experimental import pallas as pl
from jax.experimental.pallas import tpu as pltpu


def _disparity_regression_kernel(x_ref, o_ref):
    # x_ref: (1, D, tH, tW) probabilities block
    # o_ref: (1, tH, tW)    expected-disparity block (float32)
    D = x_ref.shape[1]
    tH, tW = o_ref.shape[1], o_ref.shape[2]

    def body(d, acc):
        # acc += x[:, d] * d   (weight == disparity index; accumulate in f32)
        return acc + x_ref[0, d].astype(jnp.float32) * d.astype(jnp.float32)

    acc = jax.lax.fori_loop(
        0, D, body,
        jnp.zeros((tH, tW), jnp.float32),
        unroll=min(D, 8),
    )
    o_ref[0] = acc


def _vmem_limit_bytes():
    """Explicit scoped-VMEM limit, derived from the chip's physical VMEM."""
    phys = None
    try:
        info = pltpu.get_tpu_info()
        phys = getattr(info, "vmem_capacity_bytes", None)
    except Exception:
        phys = None
    if not phys or phys <= 0:
        phys = 64 * 1024 * 1024  # conservative (v7x per-TC) fallback
    # Use up to 3/4 of physical per-core VMEM, capped at 64 MiB:
    #   v7x (64 MiB)  -> 48 MiB limit
    #   v5e/v6e (128) -> 64 MiB limit
    return int(min(64 * 1024 * 1024, (phys * 3) // 4))


def _sublane_unit(dtype):
    """Dtype-aware sublane tiling unit (f32: 8, bf16: 16, int8/fp8: 32)."""
    return {4: 8, 2: 16, 1: 32}.get(jnp.dtype(dtype).itemsize, 8)


def _pick_spatial_tiles(D, H, W, dtype, budget_bytes):
    """Choose (tH, tW). Prefer lane-dense full-W tiles; shrink tH instead."""
    itemsize = jnp.dtype(dtype).itemsize
    h_unit = _sublane_unit(dtype)

    def rows_for(width):
        return budget_bytes // max(1, D * width * itemsize)

    if rows_for(W) >= min(h_unit, H):
        # Full-W block fits with at least one sublane unit of rows.
        tW = W
    else:
        # W genuinely too large: fall back to a 128-multiple lane tile.
        max_w = rows_for(1) // max(1, h_unit) if False else (
            budget_bytes // max(1, D * h_unit * itemsize))
        tW = max(128, (max_w // 128) * 128)

    rows = rows_for(tW)
    if rows >= H:
        tH = H  # full extent is always a legal block
    else:
        tH = max(h_unit, (rows // h_unit) * h_unit)
    return tH, tW


def disparity_regression(x, maxdisp):
    """x: [B, D, H, W] (e.g. softmax over disparity). Returns float32 [B, H, W]."""
    B, D, H, W = x.shape
    assert D == maxdisp

    vmem_limit = _vmem_limit_bytes()
    # Per-input-block budget: double-buffered input + output + compiler
    # scratch must fit under vmem_limit; ~1/3 of the limit, capped at 16 MiB
    # (diminishing returns beyond that on every generation).
    budget_bytes = min(16 * 1024 * 1024, vmem_limit // 3)

    tH, tW = _pick_spatial_tiles(D, H, W, x.dtype, budget_bytes)
    grid = (B, pl.cdiv(H, tH), pl.cdiv(W, tW))

    return pl.pallas_call(
        _disparity_regression_kernel,
        out_shape=jax.ShapeDtypeStruct((B, H, W), jnp.float32),
        grid_spec=pltpu.PrefetchScalarGridSpec(
            num_scalar_prefetch=0,
            grid=grid,
            in_specs=[
                pl.BlockSpec((1, D, tH, tW), lambda b, i, j: (b, 0, i, j)),
            ],
            out_specs=pl.BlockSpec((1, tH, tW), lambda b, i, j: (b, i, j)),
        ),
        compiler_params=pltpu.CompilerParams(
            dimension_semantics=("parallel", "parallel", "parallel"),
            vmem_limit_bytes=vmem_limit,
        ),
    )(x)


if __name__ == "__main__":
    key = jax.random.PRNGKey(0)
    B, D, H, W = 2, 4, 16, 16          # D == maxdisp

    # Make the input look like disparity probabilities (softmax over axis 1),
    # matching how this module is used in PSMNet.
    logits = jax.random.normal(key, (B, D, H, W), dtype=jnp.float32)
    x = jax.nn.softmax(logits, axis=1)

    out = disparity_regression(x, maxdisp=D)
    out = jax.block_until_ready(out)

    # Reference check (plain JAX, mirrors the PyTorch forward exactly).
    disp = jnp.arange(D, dtype=jnp.float32).reshape(1, D, 1, 1)
    ref = jnp.sum(x * disp, axis=1)
    assert out.shape == (B, H, W)
    assert out.dtype == jnp.float32
    assert jnp.allclose(out, ref, atol=1e-5, rtol=1e-5)

    print("KERNEL_OK")
</pallas_src>

<mosaic_0001>
module attributes {stable_mosaic.version = 11 : i64} {
  func.func @_disparity_regression_kernel(%arg0: i32, %arg1: i32, %arg2: i32, %arg3: memref<1x4x16x16xf32, #tpu.memory_space<vmem>>, %arg4: memref<1x16x16xf32, #tpu.memory_space<vmem>>) attributes {dimension_semantics = [#tpu.dimension_semantics<parallel>, #tpu.dimension_semantics<parallel>, #tpu.dimension_semantics<parallel>], iteration_bounds = array<i64: 2, 1, 1>, scalar_prefetch = 0 : i64, scratch_operands = 0 : i64, tpu.core_type = #tpu.core_type<tc>, window_params = [{transform_indices = @transform_0, window_bounds = array<i64: 1, 4, 16, 16>}, {transform_indices = @transform_1, window_bounds = array<i64: 1, 16, 16>}]} {
    %cst = arith.constant 0.000000e+00 : f32
    %0 = vector.broadcast %cst : f32 to vector<16x16xf32>
    %c0_i32 = arith.constant 0 : i32
    %c0 = arith.constant 0 : index
    %1 = arith.index_cast %c0_i32 : i32 to index
    %c0_0 = arith.constant 0 : index
    %c0_1 = arith.constant 0 : index
    %2 = vector.load %arg3[%c0, %1, %c0_0, %c0_1] : memref<1x4x16x16xf32, #tpu.memory_space<vmem>>, vector<1x1x16x16xf32>
    %3 = vector.shape_cast %2 : vector<1x1x16x16xf32> to vector<16x16xf32>
    %4 = arith.sitofp %c0_i32 : i32 to f32
    %5 = vector.broadcast %4 : f32 to vector<16x16xf32>
    %6 = arith.mulf %3, %5 : vector<16x16xf32>
    %7 = arith.addf %0, %6 : vector<16x16xf32>
    %c1_i32 = arith.constant 1 : i32
    %c0_2 = arith.constant 0 : index
    %8 = arith.index_cast %c1_i32 : i32 to index
    %c0_3 = arith.constant 0 : index
    %c0_4 = arith.constant 0 : index
    %9 = vector.load %arg3[%c0_2, %8, %c0_3, %c0_4] : memref<1x4x16x16xf32, #tpu.memory_space<vmem>>, vector<1x1x16x16xf32>
    %10 = vector.shape_cast %9 : vector<1x1x16x16xf32> to vector<16x16xf32>
    %11 = arith.sitofp %c1_i32 : i32 to f32
    %12 = vector.broadcast %11 : f32 to vector<16x16xf32>
    %13 = arith.mulf %10, %12 : vector<16x16xf32>
    %14 = arith.addf %7, %13 : vector<16x16xf32>
    %c2_i32 = arith.constant 2 : i32
    %c0_5 = arith.constant 0 : index
    %15 = arith.index_cast %c2_i32 : i32 to index
    %c0_6 = arith.constant 0 : index
    %c0_7 = arith.constant 0 : index
    %16 = vector.load %arg3[%c0_5, %15, %c0_6, %c0_7] : memref<1x4x16x16xf32, #tpu.memory_space<vmem>>, vector<1x1x16x16xf32>
    %17 = vector.shape_cast %16 : vector<1x1x16x16xf32> to vector<16x16xf32>
    %18 = arith.sitofp %c2_i32 : i32 to f32
    %19 = vector.broadcast %18 : f32 to vector<16x16xf32>
    %20 = arith.mulf %17, %19 : vector<16x16xf32>
    %21 = arith.addf %14, %20 : vector<16x16xf32>
    %c3_i32 = arith.constant 3 : i32
    %c0_8 = arith.constant 0 : index
    %22 = arith.index_cast %c3_i32 : i32 to index
    %c0_9 = arith.constant 0 : index
    %c0_10 = arith.constant 0 : index
    %23 = vector.load %arg3[%c0_8, %22, %c0_9, %c0_10] : memref<1x4x16x16xf32, #tpu.memory_space<vmem>>, vector<1x1x16x16xf32>
    %24 = vector.shape_cast %23 : vector<1x1x16x16xf32> to vector<16x16xf32>
    %25 = arith.sitofp %c3_i32 : i32 to f32
    %26 = vector.broadcast %25 : f32 to vector<16x16xf32>
    %27 = arith.mulf %24, %26 : vector<16x16xf32>
    %28 = arith.addf %21, %27 : vector<16x16xf32>
    %c4_i32 = arith.constant 4 : i32
    %c0_11 = arith.constant 0 : index
    %c0_12 = arith.constant 0 : index
    %c0_13 = arith.constant 0 : index
    %29 = vector.load %arg4[%c0_11, %c0_12, %c0_13] : memref<1x16x16xf32, #tpu.memory_space<vmem>>, vector<1x16x16xf32>
    %30 = vector.shape_cast %29 : vector<1x16x16xf32> to vector<16x16xf32>
    %31 = vector.shape_cast %28 : vector<16x16xf32> to vector<1x16x16xf32>
    tpu.vector_store %arg4[%c0_11, %c0_12, %c0_13], %31 {strides = array<i32>} : memref<1x16x16xf32, #tpu.memory_space<vmem>>, vector<1x16x16xf32>,
    return
  }
  func.func @transform_0(%arg0: i32, %arg1: i32, %arg2: i32) -> (i32, i32, i32, i32) {
    %c0_i32 = arith.constant 0 : i32
    %c0_i32_0 = arith.constant 0 : i32
    return %arg0, %c0_i32, %arg1, %arg2 : i32, i32, i32, i32
  }
  func.func @transform_1(%arg0: i32, %arg1: i32, %arg2: i32) -> (i32, i32, i32) {
    %c0_i32 = arith.constant 0 : i32
    return %arg0, %arg1, %arg2 : i32, i32, i32
  }
}

</mosaic_0001>

<bundles_post_ra>
// kernel: tpu_custom_call.1
= control target key start
LH: loop header
LB: loop body
LE: loop exit
PB: predicated region body
PF: predicated region fallthrough
CT: control target
= control target key end

     0   :  { %6 = vsyncpa [#allocation3], 0  ;;  %s646_s0 = inlined_call_operand.hbm [shape: f32[2,4,16,16], index: 0, kind: input, shape index: {}]   ;;  %s647_s1 = inlined_call_operand.hbm [shape: f32[2,16,16], index: 1, kind: output, shape index: {}]  }
   0x1   :  { %8 = vsyncpa [#allocation3 + $0x1], 0 }
   0x2   :  { %9 = vsyncpa [#allocation4], 0 }
   0x3   :  { %11 = vsyncpa [#allocation4 + $0x1], 0  ;;  %s525_s6 = smov 0   ;;  %s527_s7 = smov 0  }
   0x4   :  { %s529_s8 = smov 0   ;;  %s531_s9 = smov 0  }
   0x5   :  { %s533_s10 = smov 0   ;;  %s535_s11 = smov 0  }
   0x6 LB: > { %s308_s12 = sadd.s32 4294967295, %s509_s11   ;;  %s309_s13 = sadd.s32 4294967294, %s509_s11   ;;  %s509_s11 = sphi %s535_s11, %s17_s11   ;;  %s505_s10 = sphi %s533_s10, %s656_s10   ;;  %s501_s9 = sphi %s531_s9, %s655_s9   ;;  %s497_s8 = sphi %s529_s8, %s654_s8   ;;  %s493_s7 = sphi %s527_s7, %s653_s7   ;;  %s489_s6 = sphi %s525_s6, %s652_s6  }
   0x7   : > { %s36_s14 = sadd.s32 1, %s505_s10  ;;  %s47_s15 = sadd.s32 1, %s497_s8 }
   0x8   : > { %p38_p0 = scmp.ge.s32.totalorder %s36_s14, 2  ;;  %p54_p1 = scmp.ne.s32.totalorder %s497_s8, %s493_s7 }
   0x9   : > { %p55_p2 = scmp.eq.s32.totalorder %s509_s11, 0  ;;  %p60_p3 = scmp.ne.s32.totalorder %s493_s7, %s489_s6 }
   0xa   : > { %s658_s14 = smov (%p38_p0, %s36_s14), 0  ;;  %p61_p5 = scmp.eq.s32.totalorder %s308_s12, 0 }
   0xb   : > { %p566_p4 = por %p55_p2, %p54_p1  ;;  %s40_s17 = ssub.s32 %s505_s10, %s658_s14 }
   0xc   : > { %p88_p6 = scmp.eq.s32.totalorder %s308_s12, 1  ;;  %p45_p7 = scmp.eq.s32.totalorder %s40_s17, 0 }
   0xd   : > { %p572_p8 = por %p61_p5, %p60_p3  ;;  %p94_p10 = scmp.eq.s32.totalorder %s309_s13, 1 }
   0xe   : > { %p576_p9 = por %p88_p6, %p54_p1  ;;  %p311_p12 = scmp.ge.s32.totalorder %s509_s11, 2 }
   0xf   : > { %s581_s20 = scalar_select %p45_p7, %s497_s8, %s47_s15  }
  0x10   : > { %p583_p11 = por %p94_p10, %p60_p3  ;;  %p343_p13 = scmp.lt.s32.totalorder %s509_s11, 2 }
  0x11   : > { %s114_s22 = sand.u32 1, %s497_s8   ;;  %s329_s24 = sshll.u32 %s505_s10, 6 }
  0x12   : > { %s312_s23 = sshll.u32 %s114_s22, 6  ;;  %s126_s27 = scalar_lea.hbm %s646_s0, %s329_s24 }
  0x13   : > { %s118_s28 = scalar_lea.vmem [#allocation2], %s312_s23  ;;  %s127_s30 = sshll.u32 %s126_s27, 4  ;;  %s128_s30 = int_to_ptr.hbm [resolvable:$true] %s127_s30 }
  0x14   : > { %s129_s29 = sshll.u32 %s118_s28, 4  ;;  %p336_p0 = pnand %p343_p13, %p566_p4  ;;  %s130_s29 = int_to_ptr.vmem [resolvable:$true] %s129_s29 }
  0x15   : > { %p315_p1 = scmp.ge.s32.totalorder %s509_s11, 1  ;;  %s115_s2 = scalar_lea.sflag [#allocation3], %s114_s22 }
  0x16   : > { %s511_s3 = smov 128   ;;  %s512_s4 = smov 8  }
  0x17   : > { %338 = dma.hbm_to_vmem [thread:$0]  (!%p336_p0), %s128_s30, 1024, %s130_s29, %s115_s2, %s511_s3, %s511_s3, %s512_s4  }
  0x18   : > { %p137_p2 = scmp.lt.s32.totalorder %s509_s11, 3 }
  0x1a   : > { %p138_p3 = pnand %p315_p1, %p137_p2 }
  0x1b   : > { %s599_s5 = sand.u32 (!%p138_p3), 1, %s493_s7  }
  0x1c   : > { %141 = sbr.rel (%p138_p3) target bundleno = 51 (0x33), region = 24  ;;  %s316_s12 = sshll.u32 (!%p138_p3), %s599_s5, 6 }
  0x1d   : > { %s144_s13 = scalar_lea.sflag (!%p138_p3), [#allocation3], %s599_s5  ;;  %s147_s15 = scalar_lea.vmem (!%p138_p3), [#allocation2], %s316_s12 }
  0x21   : > { %480 = dma.done.wait (%p572_p8), %s144_s13, 1024  }
  0x22   : > { %482 = vsyncadd (%p572_p8), %s144_s13, 4294966272  ;;  %s317_s16 = sshll.u32 %s599_s5, 4  ;;  %s330_s17 = sshll.u32 %s501_s9, 4  ;;  %v169_v0 = vld [vmem:[%s147_s15] sm:$0xff]  ;;  %v318_v1 = vld [vmem:[%s147_s15 + $0x10] sm:$0xff]  ;;  %vm194_vm0 = vcmask 130048  }
  0x23   : > { %v320_v2 = vld [vmem:[%s147_s15 + $0x20] sm:$0xff]  ;;  %v171_v3 = vmul.f32 0.0, %v169_v0  ;;  %v322_v5 = vld [vmem:[%s147_s15 + $0x30] sm:$0xff]  ;;  %v170_v6 = vld [vmem:[%s147_s15 + $0x8] sm:$0xff]  ;;  %s212_s24 = scalar_lea.hbm %s647_s1, %s330_s17  ;;  %s166_s9 = scalar_lea.vmem [#allocation5], %s317_s16 }
  0x24   : > { %v183_v4 = vmul.f32 2.0, %v320_v2  ;;  %v319_v7 = vld [vmem:[%s147_s15 + $0x18] sm:$0xff]  ;;  %v172_v8 = vmul.f32 0.0, %v170_v6  ;;  %v321_v9 = vld [vmem:[%s147_s15 + $0x28] sm:$0xff]  ;;  %v190_v12 = vmul.f32 3.0, %v322_v5  ;;  %s213_s18 = sshll.u32 %s166_s9, 4  ;;  %s214_s18 = int_to_ptr.vmem [resolvable:$true] %s213_s18 }
  0x25   : > { %v323_v10 = vld [vmem:[%s147_s15 + $0x38] sm:$0xff]  ;;  %v178_v11 = vadd.f32 %v318_v1, %v171_v3  ;;  %v184_v13 = vmul.f32 2.0, %v321_v9  ;;  %s215_s25 = sshll.u32 %s212_s24, 4  ;;  %s198_s26 = scalar_lea.sflag [#allocation4], %s599_s5  ;;  %s216_s25 = int_to_ptr.hbm [resolvable:$true] %s215_s25 }
  0x26   : > { %v179_v14 = vadd.f32 %v319_v7, %v172_v8  ;;  %v191_v15 = vmul.f32 3.0, %v323_v10  ;;  %s441_s27 = sshra.s32 %s216_s25, 4  ;;  %s447_s2 = scalar_lea.hbm %s647_s1, 32  ;;  %s442_s27 = int_to_ptr.hbm [resolvable:$true] %s441_s27 }
  0x27   : > { %v185_v16 = vadd.f32 %v183_v4, %v178_v11  ;;  %s443_s28 = scalar_lea.hbm %s442_s27, 16  ;;  %p448_p7 = scmp.lt.s32.totalorder %s442_s27, %s647_s1 }
  0x28   : > { %v186_v17 = vadd.f32 %v184_v13, %v179_v14  ;;  %p444_p4 = scmp.ne.s32.totalorder %s442_s27, %s443_s28  ;;  %p449_p8 = scmp.lt.s32.totalorder %s447_s2, %s443_s28 }
  0x29   : > { %v192_v18 = vadd.f32 %v190_v12, %v185_v16 }
  0x2a   : > { %v193_v19 = vadd.f32 %v191_v15, %v186_v17  ;;  %p445_p5 = pnand %p444_p4, %p576_p9  ;;  %p450_p10 = por %p449_p8, %p448_p7 }
  0x2b   : > { %195 = vst.msk [vmem:[%s166_s9] sm:$0xff] %vm194_vm0, %v192_v18 }
  0x2c   : > { %196 = vst.msk [vmem:[%s166_s9 + $0x8] sm:$0xff] %vm194_vm0, %v193_v19  ;;  %p446_p6 = pneg %p445_p5 }
  0x2e   : > { %p451_p13 = pnand %p450_p10, %p446_p6 }
  0x30   : > { %454 = shalt.err (!%p451_p13)
}
  0x31   : > { %s513_s5 = smov 128   ;;  %s514_s12 = smov 8  }
  0x32   : > { %333 = dma.vmem_to_hbm [thread:$0]  (%p576_p9), %s214_s18, 256, %s216_s25, %s198_s26, %s513_s5, %s513_s5, %s514_s12  }
  0x33 PF: > { %s230_s13 = sand.u32 1, %s489_s6   ;;  %p340_p0 = pnand %p311_p12, %p583_p11 }
  0x34   : > { %s231_s15 = scalar_lea.sflag [#allocation4], %s230_s13 }
  0x35   : > { %p341_p1 = pneg %p340_p0 }
  0x37   : > { %484 = dma.done.wait (%p341_p1), %s231_s15, 256  }
  0x38   : > { %486 = vsyncadd (%p341_p1), %s231_s15, 4294967040  ;;  %s17_s11 = sadd.s32 1, %s509_s11   ;;  %s652_s6 = smov %s493_s7 }
  0x39   : > { %p14_p2 = scmp.ge.s32.totalorder %s17_s11, 4   ;;  %s653_s7 = smov %s497_s8 }
  0x3a   : > { %s654_s8 = smov %s581_s20  ;;  %s655_s9 = smov %s505_s10 }
  0x3b   : > { %s656_s10 = smov %s658_s14  ;;  %16 = sbr.rel (!%p14_p2) target bundleno = 6 (0x6), region = 72 }
  0x40   :  { %237 = vsyncpa [#allocation3], 1 }
  0x41   :  { %239 = vsyncpa [#allocation3 + $0x1], 1 }
  0x42   :  { %240 = vsyncpa [#allocation4], 1 }
  0x43   :  { %242 = vsyncpa [#allocation4 + $0x1], 1 }

</bundles_post_ra>
